<compile_context>
chip_gen: v6e
topology: v6e:2x2x1
jax: 0.10.0
libtpu: 0.0.40
codegen_flags: <defaults>
</compile_context>

<pallas_src>
import functools

import jax
import jax.numpy as jnp
from jax.experimental import pallas as pl
from jax.experimental.pallas import tpu as pltpu

LANE = 128     # lane width: last-dim tiles should be multiples of this
SUBLANE = 8    # sublane width for f32


def _round_up(x, m):
    return ((x + m - 1) // m) * m


def _softplus(x):
    # numerically stable softplus: max(x,0) + log1p(exp(-|x|)) == F.softplus
    return jnp.maximum(x, 0.0) + jnp.log1p(jnp.exp(-jnp.abs(x)))


def _gaussian_kernel(x_ref, w_ref, b_ref, noise_ref, out_ref, *, zp, use_bf16):
    # One fused matmul against [W_mu | W_var]  ->  (TB, 2*zp).
    x = x_ref[...]
    w = w_ref[...]
    if use_bf16:
        # bf16 MXU operands; f32 accumulation. Elementwise math stays f32
        # (v5e's VPU/EUP have no bf16 path, so bf16 there would just add casts).
        x = x.astype(jnp.bfloat16)
        w = w.astype(jnp.bfloat16)
    pre = jnp.dot(x, w, preferred_element_type=jnp.float32) + b_ref[...]

    mu = pre[:, :zp]
    var = _softplus(pre[:, zp:])
    std = jnp.sqrt(var + 1e-10)
    z = mu + noise_ref[...] * std

    # Lane-aligned (multiple-of-128) slices of a single output slab.
    out_ref[:, 0 * zp:1 * zp] = mu
    out_ref[:, 1 * zp:2 * zp] = var
    out_ref[:, 2 * zp:3 * zp] = z


def gaussian_forward(x, w_mu, b_mu, w_var, b_var, noise, *,
                     block_b=512, use_bf16=True):
    """GMVAE Gaussian head.

    x: (B, in_dim); w_*: (in_dim, z_dim); b_*: (1, z_dim) or (z_dim,);
    noise: (B, z_dim).  Returns (mu, var, z), each (B, z_dim) float32.
    """
    x = x.astype(jnp.float32)
    B, in_dim = x.shape
    z_dim = w_mu.shape[1]

    # ---- fuse the two linears and pad z_dim to a lane-dense width ----------
    zp = _round_up(z_dim, LANE)
    pad_z = zp - z_dim

    def pad_w(w):
        return jnp.pad(w.astype(jnp.float32), ((0, 0), (0, pad_z)))

    def pad_b(b):
        return jnp.pad(b.astype(jnp.float32).reshape(1, z_dim),
                       ((0, 0), (0, pad_z)))

    w_cat = jnp.concatenate([pad_w(w_mu), pad_w(w_var)], axis=1)  # (in_dim, 2*zp)
    b_cat = jnp.concatenate([pad_b(b_mu), pad_b(b_var)], axis=1)  # (1, 2*zp)
    noise_p = jnp.pad(noise.astype(jnp.float32), ((0, 0), (0, pad_z)))

    # ---- batch tiling --------------------------------------------------------
    Bp = _round_up(B, SUBLANE)
    TB = min(Bp, block_b)
    Bp = _round_up(Bp, TB)
    if Bp != B:
        x = jnp.pad(x, ((0, Bp - B), (0, 0)))
        noise_p = jnp.pad(noise_p, ((0, Bp - B), (0, 0)))
    grid = (Bp // TB,)

    kernel = functools.partial(_gaussian_kernel, zp=zp, use_bf16=use_bf16)

    # Explicit VMEM budget: double-buffered x/noise/out tiles + resident
    # weights/bias (sized so it also fits v7x's 64 MiB physical VMEM).
    f32 = 4
    tile_bytes = 2 * f32 * (TB * in_dim + TB * zp + in_dim * 2 * zp
                            + 2 * zp + TB * 3 * zp)
    vmem_limit = int(min(max(2 * tile_bytes, 4 << 20), 96 << 20))

    cost = pl.CostEstimate(
        flops=2 * Bp * in_dim * (2 * zp),
        transcendentals=3 * Bp * zp,
        bytes_accessed=f32 * (Bp * in_dim + in_dim * 2 * zp + 2 * zp
                              + Bp * zp + Bp * 3 * zp),
    )

    out = pl.pallas_call(
        kernel,
        out_shape=jax.ShapeDtypeStruct((Bp, 3 * zp), jnp.float32),
        grid=grid,
        in_specs=[
            pl.BlockSpec((TB, in_dim), lambda i: (i, 0)),       # x tile
            pl.BlockSpec((in_dim, 2 * zp), lambda i: (0, 0)),   # fused W (resident)
            pl.BlockSpec((1, 2 * zp), lambda i: (0, 0)),        # fused b (resident)
            pl.BlockSpec((TB, zp), lambda i: (i, 0)),           # noise tile
        ],
        out_specs=pl.BlockSpec((TB, 3 * zp), lambda i: (i, 0)),
        compiler_params=pltpu.CompilerParams(
            dimension_semantics=("parallel",),
            vmem_limit_bytes=vmem_limit,
        ),
        cost_estimate=cost,
    )(x, w_cat, b_cat, noise_p)

    mu = out[:B, 0 * zp:0 * zp + z_dim]
    var = out[:B, 1 * zp:1 * zp + z_dim]
    z = out[:B, 2 * zp:2 * zp + z_dim]
    return mu, var, z


if __name__ == "__main__":
    key = jax.random.PRNGKey(0)
    k_x, k_wmu, k_bmu, k_wvar, k_bvar, k_noise = jax.random.split(key, 6)

    B, in_dim, z_dim = 8, 32, 16

    x = jax.random.normal(k_x, (B, in_dim), dtype=jnp.float32)

    # Deterministic init roughly matching nn.Linear's uniform(-1/sqrt(in), 1/sqrt(in)).
    bound = 1.0 / jnp.sqrt(jnp.float32(in_dim))
    w_mu = jax.random.uniform(k_wmu, (in_dim, z_dim), jnp.float32, -bound, bound)
    b_mu = jax.random.uniform(k_bmu, (1, z_dim), jnp.float32, -bound, bound)
    w_var = jax.random.uniform(k_wvar, (in_dim, z_dim), jnp.float32, -bound, bound)
    b_var = jax.random.uniform(k_bvar, (1, z_dim), jnp.float32, -bound, bound)

    # torch.randn_like(std) -> standard normal noise, generated here (glue).
    # TODO(synk): could be drawn in-kernel with pltpu.prng_seed/stateful_normal.
    noise = jax.random.normal(k_noise, (B, z_dim), dtype=jnp.float32)

    # Reference in plain JAX (f32).
    mu_ref = x @ w_mu + b_mu
    var_ref = jax.nn.softplus(x @ w_var + b_var)
    z_ref = mu_ref + noise * jnp.sqrt(var_ref + 1e-10)

    # 1) f32 matmul path: exact check.
    mu32, var32, z32 = gaussian_forward(x, w_mu, b_mu, w_var, b_var, noise,
                                        use_bf16=False)
    jax.block_until_ready((mu32, var32, z32))
    assert jnp.allclose(mu32, mu_ref, atol=1e-5)
    assert jnp.allclose(var32, var_ref, atol=1e-5)
    assert jnp.allclose(z32, z_ref, atol=1e-5)

    # 2) default bf16-MXU path: loose check (bf16 operand rounding).
    mu, var, z = gaussian_forward(x, w_mu, b_mu, w_var, b_var, noise,
                                  use_bf16=True)
    jax.block_until_ready((mu, var, z))
    assert jnp.allclose(mu, mu_ref, atol=5e-2, rtol=5e-2)
    assert jnp.allclose(var, var_ref, atol=5e-2, rtol=5e-2)
    assert jnp.allclose(z, z_ref, atol=5e-2, rtol=5e-2)

    print("KERNEL_OK")
</pallas_src>

<mosaic_0001>
module attributes {stable_mosaic.version = 11 : i64} {
  func.func @_gaussian_kernel(%arg0: i32, %arg1: memref<8x32xf32, #tpu.memory_space<vmem>>, %arg2: memref<32x256xf32, #tpu.memory_space<vmem>>, %arg3: memref<1x256xf32, #tpu.memory_space<vmem>>, %arg4: memref<8x128xf32, #tpu.memory_space<vmem>>, %arg5: memref<8x384xf32, #tpu.memory_space<vmem>>) attributes {dimension_semantics = [#tpu.dimension_semantics<parallel>], iteration_bounds = array<i64: 1>, scalar_prefetch = 0 : i64, scratch_operands = 0 : i64, tpu.core_type = #tpu.core_type<tc>, window_params = [{transform_indices = @transform_0, window_bounds = array<i64: 8, 32>}, {pipeline_mode = #tpu.pipeline_mode<synchronous>, transform_indices = @transform_1, window_bounds = array<i64: 32, 256>}, {pipeline_mode = #tpu.pipeline_mode<synchronous>, transform_indices = @transform_2, window_bounds = array<i64: 1, 256>}, {transform_indices = @transform_3, window_bounds = array<i64: 8, 128>}, {transform_indices = @transform_4, window_bounds = array<i64: 8, 384>}]} {
    %c0 = arith.constant 0 : index
    %c0_0 = arith.constant 0 : index
    %0 = vector.load %arg1[%c0, %c0_0] : memref<8x32xf32, #tpu.memory_space<vmem>>, vector<8x32xf32>
    %c0_1 = arith.constant 0 : index
    %c0_2 = arith.constant 0 : index
    %1 = vector.load %arg2[%c0_1, %c0_2] : memref<32x256xf32, #tpu.memory_space<vmem>>, vector<32x256xf32>
    %cst = arith.constant dense<0.000000e+00> : vector<8x256xf32>
    %2 = tpu.matmul %0, %1, %cst {dimension_numbers = #tpu.dot_dimension_numbers<[1], [0], [0], [1], [0, 0, 1, 1], [], []>} : vector<8x32xf32>, vector<32x256xf32>, vector<8x256xf32> -> vector<8x256xf32>
    %c0_3 = arith.constant 0 : index
    %c0_4 = arith.constant 0 : index
    %3 = vector.load %arg3[%c0_3, %c0_4] : memref<1x256xf32, #tpu.memory_space<vmem>>, vector<1x256xf32>
    %4 = vector.broadcast %3 : vector<1x256xf32> to vector<8x256xf32>
    %5 = arith.addf %2, %4 : vector<8x256xf32>
    %6 = vector.extract_strided_slice %5 {offsets = [0, 0], sizes = [8, 128], strides = [1, 1]} : vector<8x256xf32> to vector<8x128xf32>
    %7 = vector.extract_strided_slice %5 {offsets = [0, 128], sizes = [8, 128], strides = [1, 1]} : vector<8x256xf32> to vector<8x128xf32>
    %cst_5 = arith.constant 0.000000e+00 : f32
    %8 = vector.broadcast %cst_5 : f32 to vector<8x128xf32>
    %9 = arith.maximumf %7, %8 : vector<8x128xf32>
    %10 = math.absf %7 : vector<8x128xf32>
    %cst_6 = arith.constant 0.000000e+00 : f32
    %11 = vector.broadcast %cst_6 : f32 to vector<8x128xf32>
    %12 = arith.subf %11, %10 : vector<8x128xf32>
    %13 = math.exp %12 : vector<8x128xf32>
    %14 = math.log1p %13 : vector<8x128xf32>
    %15 = arith.addf %9, %14 : vector<8x128xf32>
    %cst_7 = arith.constant 1.000000e-10 : f32
    %16 = vector.broadcast %cst_7 : f32 to vector<8x128xf32>
    %17 = arith.addf %15, %16 : vector<8x128xf32>
    %18 = math.sqrt %17 : vector<8x128xf32>
    %c0_8 = arith.constant 0 : index
    %c0_9 = arith.constant 0 : index
    %19 = vector.load %arg4[%c0_8, %c0_9] : memref<8x128xf32, #tpu.memory_space<vmem>>, vector<8x128xf32>
    %20 = arith.mulf %19, %18 : vector<8x128xf32>
    %21 = arith.addf %6, %20 : vector<8x128xf32>
    %c0_10 = arith.constant 0 : index
    %c0_11 = arith.constant 0 : index
    %22 = vector.load %arg5[%c0_10, %c0_11] : memref<8x384xf32, #tpu.memory_space<vmem>>, vector<8x128xf32>
    tpu.vector_store %arg5[%c0_10, %c0_11], %6 {strides = array<i32>} : memref<8x384xf32, #tpu.memory_space<vmem>>, vector<8x128xf32>,
    %c0_12 = arith.constant 0 : index
    %c128 = arith.constant 128 : index
    %23 = vector.load %arg5[%c0_12, %c128] : memref<8x384xf32, #tpu.memory_space<vmem>>, vector<8x128xf32>
    tpu.vector_store %arg5[%c0_12, %c128], %15 {strides = array<i32>} : memref<8x384xf32, #tpu.memory_space<vmem>>, vector<8x128xf32>,
    %c0_13 = arith.constant 0 : index
    %c256 = arith.constant 256 : index
    %24 = vector.load %arg5[%c0_13, %c256] : memref<8x384xf32, #tpu.memory_space<vmem>>, vector<8x128xf32>
    tpu.vector_store %arg5[%c0_13, %c256], %21 {strides = array<i32>} : memref<8x384xf32, #tpu.memory_space<vmem>>, vector<8x128xf32>,
    return
  }
  func.func @transform_0(%arg0: i32) -> (i32, i32) {
    %c0_i32 = arith.constant 0 : i32
    %c0_i32_0 = arith.constant 0 : i32
    return %arg0, %c0_i32 : i32, i32
  }
  func.func @transform_1(%arg0: i32) -> (i32, i32) {
    %c0_i32 = arith.constant 0 : i32
    %c0_i32_0 = arith.constant 0 : i32
    %c0_i32_1 = arith.constant 0 : i32
    return %c0_i32, %c0_i32_0 : i32, i32
  }
  func.func @transform_2(%arg0: i32) -> (i32, i32) {
    %c0_i32 = arith.constant 0 : i32
    %c0_i32_0 = arith.constant 0 : i32
    %c0_i32_1 = arith.constant 0 : i32
    return %c0_i32, %c0_i32_0 : i32, i32
  }
  func.func @transform_3(%arg0: i32) -> (i32, i32) {
    %c0_i32 = arith.constant 0 : i32
    %c0_i32_0 = arith.constant 0 : i32
    return %arg0, %c0_i32 : i32, i32
  }
  func.func @transform_4(%arg0: i32) -> (i32, i32) {
    %c0_i32 = arith.constant 0 : i32
    %c0_i32_0 = arith.constant 0 : i32
    return %arg0, %c0_i32 : i32, i32
  }
}

</mosaic_0001>

<bundles_post_ra>
// kernel: tpu_custom_call.1
= control target key start
LH: loop header
LB: loop body
LE: loop exit
PB: predicated region body
PF: predicated region fallthrough
CT: control target
= control target key end

     0   :  { %9 = vsyncpa [#allocation3], 0  ;;  %s343_s0 = inlined_call_operand.hbm [shape: f32[8,32], index: 0, kind: input, shape index: {}]   ;;  %s344_s1 = inlined_call_operand.hbm [shape: f32[32,256], index: 1, kind: input, shape index: {}]   ;;  %s345_s2 = inlined_call_operand.vmem [shape: f32[1,256], index: 2, kind: input, shape index: {}]   ;;  %s346_s3 = inlined_call_operand.hbm [shape: f32[8,128], index: 3, kind: input, shape index: {}]   ;;  %s347_s4 = inlined_call_operand.hbm [shape: f32[8,384], index: 4, kind: output, shape index: {}]  }
   0x1   :  { %10 = vsyncpa [#allocation6], 0 }
   0x2   :  { %11 = vsyncpa [#allocation4], 0  ;;  %s296_s15 = smov [#allocation5]  }
   0x3   :  { %s27_s16 = sshll.u32 %s296_s15, 4  ;;  %s28_s16 = int_to_ptr.vmem [resolvable:$true] %s27_s16 }
   0x4   :  { %s218_s17 = scalar_lea.vmem %s28_s16, 1024  ;;  %p223_p1 = scmp.lt.s32.totalorder %s28_s16, %s28_s16 }
   0x5   :  { %p219_p0 = scmp.ne.s32.totalorder %s28_s16, %s218_s17  ;;  %p224_p2 = scmp.lt.s32.totalorder %s218_s17, %s218_s17 }
   0x7   :  { %p225_p3 = por %p224_p2, %p223_p1 }
   0x9   :  { %p226_p4 = pnand %p225_p3, %p219_p0 }
   0xb   :  { %229 = shalt.err (!%p226_p4)
}
   0xc   :  { %s297_s18 = smov 256   ;;  %s298_s19 = smov 16  }
   0xd   :  { %33 = dma.hbm_to_vmem [thread:$0]  %s344_s1, 1024, %s28_s16, [#allocation6], %s297_s18, %s297_s18, %s298_s19  }
   0xe   :  { %s299_s22 = smov [#allocation2]   ;;  %s300_s24 = smov [#allocation7]  }
   0xf   :  { %s18_s23 = sshll.u32 %s299_s22, 4  ;;  %s42_s25 = sshll.u32 %s300_s24, 4  ;;  %s19_s23 = int_to_ptr.vmem [resolvable:$true] %s18_s23  ;;  %s43_s25 = int_to_ptr.vmem [resolvable:$true] %s42_s25 }
  0x10   :  { %s238_s26 = scalar_lea.vmem %s19_s23, 128  ;;  %p243_p6 = scmp.lt.s32.totalorder %s19_s23, %s19_s23 }
  0x11   :  { %p239_p5 = scmp.ne.s32.totalorder %s19_s23, %s238_s26  ;;  %p244_p7 = scmp.lt.s32.totalorder %s238_s26, %s238_s26 }
  0x13   :  { %p245_p8 = por %p244_p7, %p243_p6 }
  0x15   :  { %p246_p9 = pnand %p245_p8, %p239_p5 }
  0x17   :  { %249 = shalt.err (!%p246_p9)
}
  0x18   :  { %21 = dma.hbm_to_vmem [thread:$0]  %s343_s0, 128, %s19_s23, [#allocation3]  }
  0x19   :  { %s258_s29 = scalar_lea.vmem %s43_s25, 128  ;;  %p263_p11 = scmp.lt.s32.totalorder %s43_s25, %s43_s25 }
  0x1a   :  { %p259_p10 = scmp.ne.s32.totalorder %s43_s25, %s258_s29  ;;  %p264_p12 = scmp.lt.s32.totalorder %s258_s29, %s258_s29 }
  0x1c   :  { %p265_p13 = por %p264_p12, %p263_p11 }
  0x1e   :  { %p266_p0 = pnand %p265_p13, %p259_p10 }
  0x20   :  { %269 = shalt.err (!%p266_p0)
}
  0x21   :  { %45 = dma.hbm_to_vmem [thread:$0]  %s346_s3, 128, %s43_s25, [#allocation6]  }
  0x22   :  { %290 = dma.done.wait [#allocation3], 128  }
  0x23   :  { %291 = vsyncadd [#allocation3], 4294967168 }
  0x24   :  { %292 = dma.done.wait [#allocation6], 1152  }
  0x25   :  { %293 = vsyncadd [#allocation6], 4294966144  ;;  %v301_v0 = vmov 0.0   ;;  %v63_v1 = vld [vmem:[#allocation5 + $0x38] sm:$0xff]  ;;  %v62_v2 = vld [vmem:[#allocation5 + $0x30] sm:$0xff]  ;;  %vm76_vm0 = vcmask 261120   ;;  %v66_v10 = vlaneseq }
  0x26   :  { %144 = vmatprep.mubr.f32.mxu0 %v301_v0  ;;  %v61_v3 = vld [vmem:[#allocation5 + $0x28] sm:$0xff]  ;;  %104 = vmatprep.subr.mxu0 %v63_v1  ;;  %v60_v4 = vld [vmem:[#allocation5 + $0x20] sm:$0xff]  ;;  %v59_v5 = vld [vmem:[#allocation5 + $0x18] sm:$0xff] }
  0x27   :  { %105 = vmatpush1.msra.mxu0 %v62_v2  ;;  %v58_v6 = vld [vmem:[#allocation5 + $0x10] sm:$0xff]  ;;  %v57_v7 = vld [vmem:[#allocation5 + $0x8] sm:$0xff]  ;;  %v56_v8 = vld [vmem:[#allocation5] sm:$0xff]  ;;  %v67_v11 = vshrl.u32 %v66_v10, 7 }
  0x28   :  { %106 = vmatprep.subr.mxu0 %v61_v3  ;;  %v55_v9 = vld [vmem:[#allocation2] sm:$0xff]  ;;  %v174_v39 = vld [vmem:[#allocation7] sm:$0xff] }
  0x29   :  { %107 = vmatpush1.msra.mxu0 %v60_v4  ;;  %v68_v12 = vsub.s32 0, %v67_v11  ;;  %v64_v13 = vld [vmem:[%s345_s2] sm:$0x3]  ;;  %v72_v14 = vsub.s32 1, %v67_v11  ;;  %s302_s2 = smov [#allocation8]  }
  0x2a   :  { %108 = vmatprep.subr.mxu0 %v59_v5  ;;  %s186_s5 = sshll.u32 %s302_s2, 4  ;;  %s187_s5 = int_to_ptr.vmem [resolvable:$true] %s186_s5 }
  0x2b   :  { %109 = vmatpush1.msra.mxu0 %v58_v6  ;;  %v69_v15 = vrot.slane %v64_v13, %v68_v12  ;;  %v73_v16 = vrot.slane %v64_v13, %v72_v14  ;;  %s270_s6 = scalar_lea.vmem %s187_s5, 384  ;;  %p275_p2 = scmp.lt.s32.totalorder %s187_s5, %s187_s5 }
  0x2c   :  { %110 = vmatprep.subr.mxu0 %v57_v7  ;;  %p271_p1 = scmp.ne.s32.totalorder %s187_s5, %s270_s6  ;;  %p276_p3 = scmp.lt.s32.totalorder %s270_s6, %s270_s6 }
  0x2d   :  { %111 = vmatpush1.msra.mxu0 %v56_v8 }
  0x2e   :  { %196 = vmatmul.mubr.msk.f32.vlgmr.msra.gmra.mxu0 %vm76_vm0, %v55_v9  ;;  %p277_p4 = por %p276_p3, %p275_p2 }
  0x30   :  { %p278_p5 = pnand %p277_p4, %p271_p1 }
  0xee   :  { %v146_v17 = vpop.f32.mrf.mxu0 }
  0xef   :  { %v147_v18 = vadd.f32 %v146_v17, %v69_v15 }
  0xf0   :  { %v148_v19 = vpop.f32.mrf.mxu0 }
  0xf1   :  { %177 = vst [vmem:[#allocation8] sm:$0xff] %v147_v18  ;;  %v149_v20 = vadd.f32 %v148_v19, %v73_v16 }
  0xf3   :  { %v152_v21 = vand.u32 2147483647, %v149_v20  ;;  %v151_v32 = vmax.f32 %v149_v20, 0.0 }
  0xf5   :  { %v153_v22 = vsub.f32 0.0, %v152_v21 }
  0xf7   :  { %v154_v23 = vmul.f32 1.442695, %v153_v22 }
  0xf9   :  { %204 = vpow2.f32 %v154_v23 }
 0x106   :  { %v205_v24 = vpop.eup %204 }
 0x107   :  { %v156_v25 = vadd.f32 1.0, %v205_v24  ;;  %v159_v26 = vmul.f32 -0.5, %v205_v24  ;;  %v162_v28 = vand.u32 2147483647, %v205_v24 }
 0x109   :  { %206 = vlog2.f32 %v156_v25  ;;  %v160_v27 = vadd.f32 1.0, %v159_v26  ;;  %vm163_vm1 = vcmp.lt.f32.partialorder %v162_v28, 0.0004427343 }
 0x10b   :  { %v161_v31 = vmul.f32 %v205_v24, %v160_v27 }
 0x116   :  { %v207_v29 = vpop.eup %206 }
 0x117   :  { %v158_v30 = vmul.f32 0.6931472, %v207_v29 }
 0x119   :  { %v164_v33 = vsel %vm163_vm1, %v161_v31, %v158_v30 }
 0x11a   :  { %v165_v34 = vadd.f32 %v164_v33, %v151_v32 }
 0x11c   :  { %v166_v35 = vadd.f32 1e-10, %v165_v34  ;;  %178 = vst [vmem:[#allocation8 + $0x8] sm:$0xff] %v165_v34 }
 0x11e   :  { %208 = vrsqrt.f32 %v166_v35  ;;  %vm169_vm2 = vcmp.eq.f32.partialorder %v166_v35, inf  ;;  %v172_v38 = vand.u32 2147483648, %v166_v35  ;;  %vm171_vm3 = vcmp.eq.f32.partialorder %v166_v35, 0.0 }
 0x12b   :  { %v209_v36 = vpop.eup %208 }
 0x12c   :  { %v168_v37 = vmul.f32 %v209_v36, %v166_v35 }
 0x12e   :  { %v170_v40 = vsel %vm169_vm2, %v166_v35, %v168_v37 }
 0x12f   :  { %v173_v41 = vsel %vm171_vm3, %v172_v38, %v170_v40 }
 0x130   :  { %v175_v42 = vmul.f32 %v174_v39, %v173_v41 }
 0x132   :  { %v176_v43 = vadd.f32 %v175_v42, %v147_v18 }
 0x134   :  { %179 = vst [vmem:[#allocation8 + $0x10] sm:$0xff] %v176_v43 }
 0x135   :  { %281 = shalt.err (!%p278_p5)
}
 0x136   :  { %189 = dma.vmem_to_hbm [thread:$0]  %s187_s5, 384, %s347_s4, [#allocation4]  }
 0x137   :  { %294 = dma.done.wait [#allocation4], 384  }
 0x138   :  { %295 = vsyncadd [#allocation4], 4294966912 }
 0x139   :  { %193 = vsyncpa [#allocation3], 1 }
 0x13a   :  { %194 = vsyncpa [#allocation6], 1 }
 0x13b   :  { %195 = vsyncpa [#allocation4], 1 }

</bundles_post_ra>
